<compile_context>
chip_gen: v7x
topology: tpu7x:2x2x1
jax: 0.10.0
libtpu: 0.0.40
codegen_flags: <defaults>
</compile_context>

<pallas_src>
import functools

import jax
import jax.numpy as jnp
from jax.experimental import pallas as pl
from jax.experimental.pallas import tpu as pltpu


# ---------------------------------------------------------------------------
# 1. Head: node_transform + chain_init + hoisted per-chain node attention proj
#    big_w columns: [ chain_init W (C*H) | per-chain attention node-proj W (C*H) ]
# ---------------------------------------------------------------------------
def head_kernel(feats_ref, wt1_ref, bt1_ref, wt2_ref, bt2_ref, bigw_ref, bci_ref,
                embeds_ref, init_ref, nproj_ref):
    C = init_ref.shape[0]
    H = embeds_ref.shape[-1]

    h1 = jnp.maximum(
        jnp.dot(feats_ref[...], wt1_ref[...], preferred_element_type=jnp.float32)
        + bt1_ref[...], 0.0)
    embeds = jnp.maximum(
        jnp.dot(h1, wt2_ref[...], preferred_element_type=jnp.float32) + bt2_ref[...], 0.0)
    embeds_ref[...] = embeds

    # One wide MXU pass produces the chain-init states AND every chain's node-side
    # attention projection (which is constant over the T reasoning steps).
    proj = jnp.dot(embeds, bigw_ref[...], preferred_element_type=jnp.float32)  # [rows, 2CH]
    init_all = proj[:, 0:C * H] + bci_ref[...]
    for c in range(C):  # static unroll: scatter into chain-major blocks (no host transpose)
        init_ref[c] = init_all[:, c * H:(c + 1) * H]
        nproj_ref[c] = proj[:, C * H + c * H:C * H + (c + 1) * H]


# ---------------------------------------------------------------------------
# 2. Chain kernel: grid=(C,), T steps fused as an in-kernel unrolled fori_loop.
#    weight slab cols: [ w1_s | W_hr | W_hz | W_hn | W_ir | W_iz | W_in ]   (7H)
#    bias slab rows  : [ b1 | w2 | b_ir+b_hr | b_iz+b_hz | b_in | b_hn | 0 | 0 ]
# ---------------------------------------------------------------------------
def chain_kernel(b2_ref, init_ref, nproj_ref, nodes_ref, w_ref, bias_ref, out_ref,
                 *, num_steps):
    H = nodes_ref.shape[-1]
    c = pl.program_id(0)

    nodes = nodes_ref[...]                                   # [N, H]  resident embeds
    bias = bias_ref[0]                                       # [8, H]  (tiny, lane-aligned rows)
    w2 = bias[1:2, :]
    b_r = bias[2:3, :]
    b_z = bias[3:4, :]
    b_in = bias[4:5, :]
    b_hn = bias[5:6, :]
    b2 = b2_ref[c]                                           # scalar (softmax-invariant, kept for fidelity)
    # node-side attention projection + layer-1 bias: constant across the T steps
    hidden_nodes = nproj_ref[0] + bias[0:1, :]               # [N, H]

    def step(_, state):                                      # state: [B, H]  (B == num_nodes)
        # One 4H-wide MXU pass: [ s_proj | W_hr.h | W_hz.h | W_hn.h ].
        # Slab slices are fed straight from the VMEM ref (never fully vreg-resident).
        sg = jnp.dot(state, w_ref[0, :, 0:4 * H], preferred_element_type=jnp.float32)
        s_proj = sg[:, 0:H]
        gh = sg[:, H:4 * H]                                  # [B, 3H]

        # additive attention over nodes + exact softmax
        # TODO(synk): optional `edges` attention mask not wired in (edges=None path only).
        # TODO(synk): for large N, chunk nodes flash-style instead of the [B,N,H] tensor.
        hidden = jnp.maximum(s_proj[:, None, :] + hidden_nodes[None, :, :], 0.0)   # [B, N, H]
        scores = jnp.sum(hidden * w2[None, :, :], axis=-1) + b2                    # [B, N]
        m = jnp.max(scores, axis=-1, keepdims=True)
        e = jnp.exp(scores - m)
        attn = e / jnp.sum(e, axis=-1, keepdims=True)
        context = jnp.dot(attn, nodes, preferred_element_type=jnp.float32)         # [B, H]

        # fused GRU input-gate projections: context @ [W_ir | W_iz | W_in]
        # (starts at column 4H -> 128-lane aligned whenever H % 32 == 0)
        gi = jnp.dot(context, w_ref[0, :, 4 * H:7 * H],
                     preferred_element_type=jnp.float32)                            # [B, 3H]
        r = jax.nn.sigmoid(gi[:, 0:H] + gh[:, 0:H] + b_r)
        z = jax.nn.sigmoid(gi[:, H:2 * H] + gh[:, H:2 * H] + b_z)
        n = jnp.tanh(gi[:, 2 * H:3 * H] + b_in + r * (gh[:, 2 * H:3 * H] + b_hn))
        return (1.0 - z) * n + z * state

    # T steps in-kernel; final state stored once per chain.
    out_ref[0] = jax.lax.fori_loop(0, num_steps, step, init_ref[0], unroll=True)


# ---------------------------------------------------------------------------
# 3. Tail: attention_aggregator + predictor, concat folded into per-chain GEMM acc.
# ---------------------------------------------------------------------------
def tail_kernel(cs_ref, wa1_ref, ba1_ref, wa2_ref, ba2_ref, wp_ref, bp_ref,
                final_ref, pred_ref):
    c = pl.program_id(0)

    @pl.when(c == 0)
    def _():
        final_ref[...] = jnp.zeros_like(final_ref)

    # concat([cs_0..cs_{C-1}]) @ wa1  ==  sum_c cs_c @ wa1[c*H:(c+1)*H, :]
    final_ref[...] += jnp.dot(cs_ref[0], wa1_ref[0], preferred_element_type=jnp.float32)

    @pl.when(c == pl.num_programs(0) - 1)
    def _():
        hidden = jnp.maximum(final_ref[...] + ba1_ref[...], 0.0)
        final = jnp.dot(hidden, wa2_ref[...], preferred_element_type=jnp.float32) + ba2_ref[...]
        final_ref[...] = final
        pred_ref[...] = (
            jnp.dot(final, wp_ref[...], preferred_element_type=jnp.float32) + bp_ref[...])


# ---------------------------------------------------------------------------
# Host-side packing + wrapper
# ---------------------------------------------------------------------------
def pack_chain_params(p):
    """Pack per-chain ChainIterator params: [C,H,7H] weight slab + [C,8,H] bias slab."""
    # TODO(synk): on v6e/v7x store slabs + node embeds in bf16 (halves DMA/VMEM); kept
    # f32 here for a tight correctness check against the f32 reference.
    w_slab = jnp.concatenate(
        [p["w1s"], p["whr"], p["whz"], p["whn"], p["wir"], p["wiz"], p["win"]],
        axis=2)                                                          # [C, H, 7H]
    zeros = jnp.zeros_like(p["b1"])
    b_slab = jnp.stack(
        [p["b1"],                       # attention layer-1 bias
         p["w2"],                       # attention layer-2 weight (row vector)
         p["bir"] + p["bhr"],           # r-gate bias (pre-added)
         p["biz"] + p["bhz"],           # z-gate bias (pre-added)
         p["bin"], p["bhn"],            # n-gate biases (must stay separate)
         zeros, zeros], axis=1)                                          # [C, 8, H]
    return w_slab, b_slab


def multi_chain_reasoner(node_feats, params, num_chains, chain_length):
    N, D = node_feats.shape
    H = params["wt2"].shape[0]
    C, T = num_chains, chain_length

    # one-time host-side weight packing (weights only; no activation transposes)
    w1n_wide = jnp.transpose(params["w1n"], (1, 0, 2)).reshape(H, C * H)
    big_w = jnp.concatenate([params["wci"], w1n_wide], axis=1)           # [H, 2*C*H]
    w_slab, b_slab = pack_chain_params(params)
    wa1_blocked = params["wa1"].reshape(C, H, H)                         # per-chain rows of wa1

    # ---- head: node_transform + chain_init + hoisted node attention projection ----
    rt = N if N <= 512 else 512                   # row tile; grid=(1,) at toy sizes
    grid_rows = pl.cdiv(N, rt)
    node_embeds, init_states, node_proj = pl.pallas_call(
        head_kernel,
        out_shape=(jax.ShapeDtypeStruct((N, H), jnp.float32),
                   jax.ShapeDtypeStruct((C, N, H), jnp.float32),
                   jax.ShapeDtypeStruct((C, N, H), jnp.float32)),
        grid_spec=pltpu.PrefetchScalarGridSpec(
            num_scalar_prefetch=0,
            grid=(grid_rows,),
            in_specs=[
                pl.BlockSpec((rt, D), lambda i: (i, 0)),                 # node feats (row tile)
                pl.BlockSpec((D, H), lambda i: (0, 0)),                  # weights: resident
                pl.BlockSpec((1, H), lambda i: (0, 0)),
                pl.BlockSpec((H, H), lambda i: (0, 0)),
                pl.BlockSpec((1, H), lambda i: (0, 0)),
                pl.BlockSpec((H, 2 * C * H), lambda i: (0, 0)),
                pl.BlockSpec((1, C * H), lambda i: (0, 0)),
            ],
            out_specs=[
                pl.BlockSpec((rt, H), lambda i: (i, 0)),
                pl.BlockSpec((C, rt, H), lambda i: (0, i, 0)),
                pl.BlockSpec((C, rt, H), lambda i: (0, i, 0)),
            ]),
        compiler_params=pltpu.CompilerParams(dimension_semantics=("parallel",)),
    )(node_feats, params["wt1"], params["bt1"], params["wt2"], params["bt2"],
      big_w, params["bci"])

    # ---- all chains: grid=(C,) only, T steps fused in-kernel ----
    chain_states = pl.pallas_call(
        functools.partial(chain_kernel, num_steps=T),
        out_shape=jax.ShapeDtypeStruct((C, N, H), jnp.float32),
        grid_spec=pltpu.PrefetchScalarGridSpec(
            num_scalar_prefetch=0,
            grid=(C,),
            in_specs=[
                pl.BlockSpec(memory_space=pltpu.MemorySpace.SMEM),       # b2 scalar table [C]
                pl.BlockSpec((1, N, H), lambda c: (c, 0, 0)),            # init state (1 DMA/chain)
                pl.BlockSpec((1, N, H), lambda c: (c, 0, 0)),            # hoisted node proj
                pl.BlockSpec((N, H), lambda c: (0, 0)),                  # node embeds, resident
                pl.BlockSpec((1, H, 7 * H), lambda c: (c, 0, 0)),        # per-chain weight slab
                pl.BlockSpec((1, 8, H), lambda c: (c, 0, 0)),            # per-chain bias slab
            ],
            out_specs=pl.BlockSpec((1, N, H), lambda c: (c, 0, 0))),
        # TODO(synk): on v7x use pltpu.CORE_PARALLEL on the chain axis to shard the
        # (fully independent) chains across the two TensorCores.
        compiler_params=pltpu.CompilerParams(dimension_semantics=("parallel",)),
    )(params["b2"], init_states, node_proj, node_embeds, w_slab, b_slab)

    # ---- tail: aggregator + predictor (concat folded into per-chain accumulation) ----
    final_output, prediction = pl.pallas_call(
        tail_kernel,
        out_shape=(jax.ShapeDtypeStruct((N, H), jnp.float32),
                   jax.ShapeDtypeStruct((N, 1), jnp.float32)),
        grid_spec=pltpu.PrefetchScalarGridSpec(
            num_scalar_prefetch=0,
            grid=(C,),
            in_specs=[
                pl.BlockSpec((1, N, H), lambda c: (c, 0, 0)),            # chain state c
                pl.BlockSpec((1, H, H), lambda c: (c, 0, 0)),            # wa1 row-block c
                pl.BlockSpec((1, H), lambda c: (0, 0)),
                pl.BlockSpec((H, H), lambda c: (0, 0)),
                pl.BlockSpec((1, H), lambda c: (0, 0)),
                pl.BlockSpec((H, 1), lambda c: (0, 0)),
                pl.BlockSpec((1, 1), lambda c: (0, 0)),
            ],
            out_specs=[
                pl.BlockSpec((N, H), lambda c: (0, 0)),                  # revisited accumulator
                pl.BlockSpec((N, 1), lambda c: (0, 0)),
            ]),
        compiler_params=pltpu.CompilerParams(dimension_semantics=("arbitrary",)),
    )(chain_states, wa1_blocked, params["ba1"], params["wa2"], params["ba2"],
      params["wp"], params["bp"])

    # TODO(synk): torch's softmax(matmul(final_output, stacked.squeeze(2)), dim=1) is only
    # shape-consistent when hidden_dim == num_chains; we compute the intended per-chain
    # dot-product attention instead (plain JAX, negligible cost).
    scores = jnp.einsum("nh,cnh->nc", final_output, chain_states)
    attention_weights = jax.nn.softmax(scores, axis=1)
    chain_outputs = [chain_states[i] for i in range(C)]
    return chain_outputs, final_output, attention_weights, prediction


# ---------------------------------------------------------------------------
# Deterministic synthetic parameters + pure-JAX reference
# ---------------------------------------------------------------------------
def init_params(key, node_dim, hidden_dim, num_chains):
    D, H, C = node_dim, hidden_dim, num_chains
    keys = iter(jax.random.split(key, 32))

    def w(shape, scale):
        return jax.random.normal(next(keys), shape, jnp.float32) * scale

    sD, sH = 1.0 / jnp.sqrt(D), 1.0 / jnp.sqrt(H)
    s2H, sCH = 1.0 / jnp.sqrt(2.0 * H), 1.0 / jnp.sqrt(1.0 * C * H)
    return {
        # node_transform
        "wt1": w((D, H), sD), "bt1": w((1, H), sD),
        "wt2": w((H, H), sH), "bt2": w((1, H), sH),
        # chain_init
        "wci": w((H, C * H), sH), "bci": w((1, C * H), sH),
        # per-chain attention MLP (stacked over C)
        "w1s": w((C, H, H), s2H), "w1n": w((C, H, H), s2H), "b1": w((C, H), s2H),
        "w2": w((C, H), sH), "b2": w((C,), sH),
        # per-chain GRUCell
        "wir": w((C, H, H), sH), "wiz": w((C, H, H), sH), "win": w((C, H, H), sH),
        "whr": w((C, H, H), sH), "whz": w((C, H, H), sH), "whn": w((C, H, H), sH),
        "bir": w((C, H), sH), "biz": w((C, H), sH), "bin": w((C, H), sH),
        "bhr": w((C, H), sH), "bhz": w((C, H), sH), "bhn": w((C, H), sH),
        # attention_aggregator + predictor
        "wa1": w((C * H, H), sCH), "ba1": w((1, H), sCH),
        "wa2": w((H, H), sH), "ba2": w((1, H), sH),
        "wp": w((H, 1), sH), "bp": w((1, 1), sH),
    }


def chain_iterator_ref(state, nodes, p, i):
    s_proj = state @ p["w1s"][i]
    n_proj = nodes @ p["w1n"][i]
    hidden = jnp.maximum(s_proj[:, None, :] + n_proj[None, :, :] + p["b1"][i], 0.0)
    scores = jnp.sum(hidden * p["w2"][i][None, None, :], axis=-1) + p["b2"][i]
    attn = jax.nn.softmax(scores, axis=1)
    context = attn @ nodes
    r = jax.nn.sigmoid(context @ p["wir"][i] + p["bir"][i] + state @ p["whr"][i] + p["bhr"][i])
    z = jax.nn.sigmoid(context @ p["wiz"][i] + p["biz"][i] + state @ p["whz"][i] + p["bhz"][i])
    n = jnp.tanh(context @ p["win"][i] + p["bin"][i] + r * (state @ p["whn"][i] + p["bhn"][i]))
    return (1.0 - z) * n + z * state


def multi_chain_reasoner_ref(node_feats, p, num_chains, chain_length):
    N = node_feats.shape[0]
    H = p["wt2"].shape[0]
    C, T = num_chains, chain_length
    h1 = jnp.maximum(node_feats @ p["wt1"] + p["bt1"], 0.0)
    node_embeds = jnp.maximum(h1 @ p["wt2"] + p["bt2"], 0.0)
    chain0 = (node_embeds @ p["wci"] + p["bci"]).reshape(N, C, H)
    chain_outputs = []
    for i in range(C):
        state = chain0[:, i, :]
        for _ in range(T):
            state = chain_iterator_ref(state, node_embeds, p, i)
        chain_outputs.append(state)
    concatenated = jnp.concatenate(chain_outputs, axis=1)
    hidden = jnp.maximum(concatenated @ p["wa1"] + p["ba1"], 0.0)
    final_output = hidden @ p["wa2"] + p["ba2"]
    prediction = final_output @ p["wp"] + p["bp"]
    stacked = jnp.stack(chain_outputs, axis=0)                 # [C, N, H]
    scores = jnp.einsum("nh,cnh->nc", final_output, stacked)
    attention_weights = jax.nn.softmax(scores, axis=1)
    return stacked, final_output, attention_weights, prediction


if __name__ == "__main__":
    jax.config.update("jax_default_matmul_precision", "highest")

    N, D, H = 8, 16, 32          # num_nodes (== batch in this module), node_dim, hidden_dim
    C, T = 4, 3                  # num_reasoning_chains, chain_length (small test sizes)

    key = jax.random.PRNGKey(0)
    k_feats, k_params = jax.random.split(key)
    node_feats = jax.random.normal(k_feats, (N, D), jnp.float32)
    params = init_params(k_params, D, H, C)

    chain_outputs, final_output, attention_weights, prediction = multi_chain_reasoner(
        node_feats, params, C, T)
    final_output = jax.block_until_ready(final_output)

    ref_stack, ref_final, ref_attn, ref_pred = multi_chain_reasoner_ref(
        node_feats, params, C, T)

    got_stack = jnp.stack(chain_outputs, axis=0)
    tol = dict(atol=2e-3, rtol=2e-3)
    assert got_stack.shape == (C, N, H)
    assert final_output.shape == (N, H) and prediction.shape == (N, 1)
    assert attention_weights.shape == (N, C)
    assert jnp.allclose(got_stack, ref_stack, **tol), "chain states mismatch"
    assert jnp.allclose(final_output, ref_final, **tol), "final output mismatch"
    assert jnp.allclose(attention_weights, ref_attn, **tol), "attention weights mismatch"
    assert jnp.allclose(prediction, ref_pred, **tol), "prediction mismatch"

    print("KERNEL_OK")
</pallas_src>

<mosaic_0001>
module attributes {stable_mosaic.version = 11 : i64} {
  func.func @head_kernel(%arg0: i32, %arg1: memref<8x16xf32, #tpu.memory_space<vmem>>, %arg2: memref<16x32xf32, #tpu.memory_space<vmem>>, %arg3: memref<1x32xf32, #tpu.memory_space<vmem>>, %arg4: memref<32x32xf32, #tpu.memory_space<vmem>>, %arg5: memref<1x32xf32, #tpu.memory_space<vmem>>, %arg6: memref<32x256xf32, #tpu.memory_space<vmem>>, %arg7: memref<1x128xf32, #tpu.memory_space<vmem>>, %arg8: memref<8x32xf32, #tpu.memory_space<vmem>>, %arg9: memref<4x8x32xf32, #tpu.memory_space<vmem>>, %arg10: memref<4x8x32xf32, #tpu.memory_space<vmem>>) attributes {dimension_semantics = [#tpu.dimension_semantics<parallel>], iteration_bounds = array<i64: 1>, scalar_prefetch = 0 : i64, scratch_operands = 0 : i64, tpu.core_type = #tpu.core_type<tc>, window_params = [{transform_indices = @transform_0, window_bounds = array<i64: 8, 16>}, {pipeline_mode = #tpu.pipeline_mode<synchronous>, transform_indices = @transform_1, window_bounds = array<i64: 16, 32>}, {pipeline_mode = #tpu.pipeline_mode<synchronous>, transform_indices = @transform_2, window_bounds = array<i64: 1, 32>}, {pipeline_mode = #tpu.pipeline_mode<synchronous>, transform_indices = @transform_3, window_bounds = array<i64: 32, 32>}, {pipeline_mode = #tpu.pipeline_mode<synchronous>, transform_indices = @transform_4, window_bounds = array<i64: 1, 32>}, {pipeline_mode = #tpu.pipeline_mode<synchronous>, transform_indices = @transform_5, window_bounds = array<i64: 32, 256>}, {pipeline_mode = #tpu.pipeline_mode<synchronous>, transform_indices = @transform_6, window_bounds = array<i64: 1, 128>}, {transform_indices = @transform_7, window_bounds = array<i64: 8, 32>}, {transform_indices = @transform_8, window_bounds = array<i64: 4, 8, 32>}, {transform_indices = @transform_9, window_bounds = array<i64: 4, 8, 32>}]} {
    %c0 = arith.constant 0 : index
    %c0_0 = arith.constant 0 : index
    %0 = vector.load %arg1[%c0, %c0_0] : memref<8x16xf32, #tpu.memory_space<vmem>>, vector<8x16xf32>
    %c0_1 = arith.constant 0 : index
    %c0_2 = arith.constant 0 : index
    %1 = vector.load %arg2[%c0_1, %c0_2] : memref<16x32xf32, #tpu.memory_space<vmem>>, vector<16x32xf32>
    %cst = arith.constant dense<0.000000e+00> : vector<8x32xf32>
    %2 = tpu.matmul %0, %1, %cst {dimension_numbers = #tpu.dot_dimension_numbers<[1], [0], [0], [1], [0, 0, 1, 1], [], []>, precision = #tpu.contract_precision<fp32>} : vector<8x16xf32>, vector<16x32xf32>, vector<8x32xf32> -> vector<8x32xf32>
    %c0_3 = arith.constant 0 : index
    %c0_4 = arith.constant 0 : index
    %3 = vector.load %arg3[%c0_3, %c0_4] : memref<1x32xf32, #tpu.memory_space<vmem>>, vector<1x32xf32>
    %4 = vector.broadcast %3 : vector<1x32xf32> to vector<8x32xf32>
    %5 = arith.addf %2, %4 : vector<8x32xf32>
    %cst_5 = arith.constant 0.000000e+00 : f32
    %6 = vector.broadcast %cst_5 : f32 to vector<8x32xf32>
    %7 = arith.maximumf %5, %6 : vector<8x32xf32>
    %c0_6 = arith.constant 0 : index
    %c0_7 = arith.constant 0 : index
    %8 = vector.load %arg4[%c0_6, %c0_7] : memref<32x32xf32, #tpu.memory_space<vmem>>, vector<32x32xf32>
    %cst_8 = arith.constant dense<0.000000e+00> : vector<8x32xf32>
    %9 = tpu.matmul %7, %8, %cst_8 {dimension_numbers = #tpu.dot_dimension_numbers<[1], [0], [0], [1], [0, 0, 1, 1], [], []>, precision = #tpu.contract_precision<fp32>} : vector<8x32xf32>, vector<32x32xf32>, vector<8x32xf32> -> vector<8x32xf32>
    %c0_9 = arith.constant 0 : index
    %c0_10 = arith.constant 0 : index
    %10 = vector.load %arg5[%c0_9, %c0_10] : memref<1x32xf32, #tpu.memory_space<vmem>>, vector<1x32xf32>
    %11 = vector.broadcast %10 : vector<1x32xf32> to vector<8x32xf32>
    %12 = arith.addf %9, %11 : vector<8x32xf32>
    %cst_11 = arith.constant 0.000000e+00 : f32
    %13 = vector.broadcast %cst_11 : f32 to vector<8x32xf32>
    %14 = arith.maximumf %12, %13 : vector<8x32xf32>
    %c0_12 = arith.constant 0 : index
    %c0_13 = arith.constant 0 : index
    %15 = vector.load %arg8[%c0_12, %c0_13] : memref<8x32xf32, #tpu.memory_space<vmem>>, vector<8x32xf32>
    tpu.vector_store %arg8[%c0_12, %c0_13], %14 {strides = array<i32>} : memref<8x32xf32, #tpu.memory_space<vmem>>, vector<8x32xf32>,
    %c0_14 = arith.constant 0 : index
    %c0_15 = arith.constant 0 : index
    %16 = vector.load %arg6[%c0_14, %c0_15] : memref<32x256xf32, #tpu.memory_space<vmem>>, vector<32x256xf32>
    %cst_16 = arith.constant dense<0.000000e+00> : vector<8x256xf32>
    %17 = tpu.matmul %14, %16, %cst_16 {dimension_numbers = #tpu.dot_dimension_numbers<[1], [0], [0], [1], [0, 0, 1, 1], [], []>, precision = #tpu.contract_precision<fp32>} : vector<8x32xf32>, vector<32x256xf32>, vector<8x256xf32> -> vector<8x256xf32>
    %18 = vector.extract_strided_slice %17 {offsets = [0, 0], sizes = [8, 128], strides = [1, 1]} : vector<8x256xf32> to vector<8x128xf32>
    %c0_17 = arith.constant 0 : index
    %c0_18 = arith.constant 0 : index
    %19 = vector.load %arg7[%c0_17, %c0_18] : memref<1x128xf32, #tpu.memory_space<vmem>>, vector<1x128xf32>
    %20 = vector.broadcast %19 : vector<1x128xf32> to vector<8x128xf32>
    %21 = arith.addf %18, %20 : vector<8x128xf32>
    %22 = vector.extract_strided_slice %21 {offsets = [0, 0], sizes = [8, 32], strides = [1, 1]} : vector<8x128xf32> to vector<8x32xf32>
    %c0_19 = arith.constant 0 : index
    %c0_20 = arith.constant 0 : index
    %c0_21 = arith.constant 0 : index
    %23 = vector.load %arg9[%c0_19, %c0_20, %c0_21] : memref<4x8x32xf32, #tpu.memory_space<vmem>>, vector<1x8x32xf32>
    %24 = vector.shape_cast %23 : vector<1x8x32xf32> to vector<8x32xf32>
    %25 = vector.shape_cast %22 : vector<8x32xf32> to vector<1x8x32xf32>
    tpu.vector_store %arg9[%c0_19, %c0_20, %c0_21], %25 {strides = array<i32>} : memref<4x8x32xf32, #tpu.memory_space<vmem>>, vector<1x8x32xf32>,
    %26 = vector.extract_strided_slice %17 {offsets = [0, 128], sizes = [8, 32], strides = [1, 1]} : vector<8x256xf32> to vector<8x32xf32>
    %c0_22 = arith.constant 0 : index
    %c0_23 = arith.constant 0 : index
    %c0_24 = arith.constant 0 : index
    %27 = vector.load %arg10[%c0_22, %c0_23, %c0_24] : memref<4x8x32xf32, #tpu.memory_space<vmem>>, vector<1x8x32xf32>
    %28 = vector.shape_cast %27 : vector<1x8x32xf32> to vector<8x32xf32>
    %29 = vector.shape_cast %26 : vector<8x32xf32> to vector<1x8x32xf32>
    tpu.vector_store %arg10[%c0_22, %c0_23, %c0_24], %29 {strides = array<i32>} : memref<4x8x32xf32, #tpu.memory_space<vmem>>, vector<1x8x32xf32>,
    %30 = vector.extract_strided_slice %21 {offsets = [0, 32], sizes = [8, 32], strides = [1, 1]} : vector<8x128xf32> to vector<8x32xf32>
    %c1 = arith.constant 1 : index
    %c0_25 = arith.constant 0 : index
    %c0_26 = arith.constant 0 : index
    %31 = vector.load %arg9[%c1, %c0_25, %c0_26] : memref<4x8x32xf32, #tpu.memory_space<vmem>>, vector<1x8x32xf32>
    %32 = vector.shape_cast %31 : vector<1x8x32xf32> to vector<8x32xf32>
    %33 = vector.shape_cast %30 : vector<8x32xf32> to vector<1x8x32xf32>
    tpu.vector_store %arg9[%c1, %c0_25, %c0_26], %33 {strides = array<i32>} : memref<4x8x32xf32, #tpu.memory_space<vmem>>, vector<1x8x32xf32>,
    %34 = vector.extract_strided_slice %17 {offsets = [0, 160], sizes = [8, 32], strides = [1, 1]} : vector<8x256xf32> to vector<8x32xf32>
    %c1_27 = arith.constant 1 : index
    %c0_28 = arith.constant 0 : index
    %c0_29 = arith.constant 0 : index
    %35 = vector.load %arg10[%c1_27, %c0_28, %c0_29] : memref<4x8x32xf32, #tpu.memory_space<vmem>>, vector<1x8x32xf32>
    %36 = vector.shape_cast %35 : vector<1x8x32xf32> to vector<8x32xf32>
    %37 = vector.shape_cast %34 : vector<8x32xf32> to vector<1x8x32xf32>
    tpu.vector_store %arg10[%c1_27, %c0_28, %c0_29], %37 {strides = array<i32>} : memref<4x8x32xf32, #tpu.memory_space<vmem>>, vector<1x8x32xf32>,
    %38 = vector.extract_strided_slice %21 {offsets = [0, 64], sizes = [8, 32], strides = [1, 1]} : vector<8x128xf32> to vector<8x32xf32>
    %c2 = arith.constant 2 : index
    %c0_30 = arith.constant 0 : index
    %c0_31 = arith.constant 0 : index
    %39 = vector.load %arg9[%c2, %c0_30, %c0_31] : memref<4x8x32xf32, #tpu.memory_space<vmem>>, vector<1x8x32xf32>
    %40 = vector.shape_cast %39 : vector<1x8x32xf32> to vector<8x32xf32>
    %41 = vector.shape_cast %38 : vector<8x32xf32> to vector<1x8x32xf32>
    tpu.vector_store %arg9[%c2, %c0_30, %c0_31], %41 {strides = array<i32>} : memref<4x8x32xf32, #tpu.memory_space<vmem>>, vector<1x8x32xf32>,
    %42 = vector.extract_strided_slice %17 {offsets = [0, 192], sizes = [8, 32], strides = [1, 1]} : vector<8x256xf32> to vector<8x32xf32>
    %c2_32 = arith.constant 2 : index
    %c0_33 = arith.constant 0 : index
    %c0_34 = arith.constant 0 : index
    %43 = vector.load %arg10[%c2_32, %c0_33, %c0_34] : memref<4x8x32xf32, #tpu.memory_space<vmem>>, vector<1x8x32xf32>
    %44 = vector.shape_cast %43 : vector<1x8x32xf32> to vector<8x32xf32>
    %45 = vector.shape_cast %42 : vector<8x32xf32> to vector<1x8x32xf32>
    tpu.vector_store %arg10[%c2_32, %c0_33, %c0_34], %45 {strides = array<i32>} : memref<4x8x32xf32, #tpu.memory_space<vmem>>, vector<1x8x32xf32>,
    %46 = vector.extract_strided_slice %21 {offsets = [0, 96], sizes = [8, 32], strides = [1, 1]} : vector<8x128xf32> to vector<8x32xf32>
    %c3 = arith.constant 3 : index
    %c0_35 = arith.constant 0 : index
    %c0_36 = arith.constant 0 : index
    %47 = vector.load %arg9[%c3, %c0_35, %c0_36] : memref<4x8x32xf32, #tpu.memory_space<vmem>>, vector<1x8x32xf32>
    %48 = vector.shape_cast %47 : vector<1x8x32xf32> to vector<8x32xf32>
    %49 = vector.shape_cast %46 : vector<8x32xf32> to vector<1x8x32xf32>
    tpu.vector_store %arg9[%c3, %c0_35, %c0_36], %49 {strides = array<i32>} : memref<4x8x32xf32, #tpu.memory_space<vmem>>, vector<1x8x32xf32>,
    %50 = vector.extract_strided_slice %17 {offsets = [0, 224], sizes = [8, 32], strides = [1, 1]} : vector<8x256xf32> to vector<8x32xf32>
    %c3_37 = arith.constant 3 : index
    %c0_38 = arith.constant 0 : index
    %c0_39 = arith.constant 0 : index
    %51 = vector.load %arg10[%c3_37, %c0_38, %c0_39] : memref<4x8x32xf32, #tpu.memory_space<vmem>>, vector<1x8x32xf32>
    %52 = vector.shape_cast %51 : vector<1x8x32xf32> to vector<8x32xf32>
    %53 = vector.shape_cast %50 : vector<8x32xf32> to vector<1x8x32xf32>
    tpu.vector_store %arg10[%c3_37, %c0_38, %c0_39], %53 {strides = array<i32>} : memref<4x8x32xf32, #tpu.memory_space<vmem>>, vector<1x8x32xf32>,
    return
  }
  func.func @transform_0(%arg0: i32) -> (i32, i32) {
    %c0_i32 = arith.constant 0 : i32
    %c0_i32_0 = arith.constant 0 : i32
    return %arg0, %c0_i32 : i32, i32
  }
  func.func @transform_1(%arg0: i32) -> (i32, i32) {
    %c0_i32 = arith.constant 0 : i32
    %c0_i32_0 = arith.constant 0 : i32
    %c0_i32_1 = arith.constant 0 : i32
    return %c0_i32, %c0_i32_0 : i32, i32
  }
  func.func @transform_2(%arg0: i32) -> (i32, i32) {
    %c0_i32 = arith.constant 0 : i32
    %c0_i32_0 = arith.constant 0 : i32
    %c0_i32_1 = arith.constant 0 : i32
    return %c0_i32, %c0_i32_0 : i32, i32
  }
  func.func @transform_3(%arg0: i32) -> (i32, i32) {
    %c0_i32 = arith.constant 0 : i32
    %c0_i32_0 = arith.constant 0 : i32
    %c0_i32_1 = arith.constant 0 : i32
    return %c0_i32, %c0_i32_0 : i32, i32
  }
  func.func @transform_4(%arg0: i32) -> (i32, i32) {
    %c0_i32 = arith.constant 0 : i32
    %c0_i32_0 = arith.constant 0 : i32
    %c0_i32_1 = arith.constant 0 : i32
    return %c0_i32, %c0_i32_0 : i32, i32
  }
  func.func @transform_5(%arg0: i32) -> (i32, i32) {
    %c0_i32 = arith.constant 0 : i32
    %c0_i32_0 = arith.constant 0 : i32
    %c0_i32_1 = arith.constant 0 : i32
    return %c0_i32, %c0_i32_0 : i32, i32
  }
  func.func @transform_6(%arg0: i32) -> (i32, i32) {
    %c0_i32 = arith.constant 0 : i32
    %c0_i32_0 = arith.constant 0 : i32
    %c0_i32_1 = arith.constant 0 : i32
    return %c0_i32, %c0_i32_0 : i32, i32
  }
  func.func @transform_7(%arg0: i32) -> (i32, i32) {
    %c0_i32 = arith.constant 0 : i32
    %c0_i32_0 = arith.constant 0 : i32
    return %arg0, %c0_i32 : i32, i32
  }
  func.func @transform_8(%arg0: i32) -> (i32, i32, i32) {
    %c0_i32 = arith.constant 0 : i32
    %c0_i32_0 = arith.constant 0 : i32
    %c0_i32_1 = arith.constant 0 : i32
    return %c0_i32, %arg0, %c0_i32_0 : i32, i32, i32
  }
  func.func @transform_9(%arg0: i32) -> (i32, i32, i32) {
    %c0_i32 = arith.constant 0 : i32
    %c0_i32_0 = arith.constant 0 : i32
    %c0_i32_1 = arith.constant 0 : i32
    return %c0_i32, %arg0, %c0_i32_0 : i32, i32, i32
  }
}

</mosaic_0001>

<bundles_post_ra>
// kernel: tpu_custom_call.1
= control target key start
LH: loop header
LB: loop body
LE: loop exit
PB: predicated region body
PF: predicated region fallthrough
CT: control target
= control target key end

     0   :  { %15 = vsyncpa [#allocation3], 0  ;;  %s2428_s0 = inlined_call_operand.hbm [shape: f32[8,16], index: 0, kind: input, shape index: {}]   ;;  %s2429_s1 = inlined_call_operand.hbm [shape: f32[16,32], index: 1, kind: input, shape index: {}]   ;;  %s2430_s2 = inlined_call_operand.vmem [shape: f32[1,32], index: 2, kind: input, shape index: {}]   ;;  %s2431_s3 = inlined_call_operand.hbm [shape: f32[32,32], index: 3, kind: input, shape index: {}]   ;;  %s2432_s4 = inlined_call_operand.vmem [shape: f32[1,32], index: 4, kind: input, shape index: {}]   ;;  %s2433_s5 = inlined_call_operand.hbm [shape: f32[32,256], index: 5, kind: input, shape index: {}]   ;;  %s2434_s6 = inlined_call_operand.vmem [shape: f32[1,128], index: 6, kind: input, shape index: {}]   ;;  %s2435_s7 = inlined_call_operand.hbm [shape: f32[8,32], index: 7, kind: output, shape index: {0}]   ;;  %s2436_s8 = inlined_call_operand.hbm [shape: f32[4,8,32], index: 8, kind: output, shape index: {1}]   ;;  %s2437_s9 = inlined_call_operand.hbm [shape: f32[4,8,32], index: 9, kind: output, shape index: {2}]  }
   0x1   :  { %16 = vsyncpa [#allocation6], 0 }
   0x2   :  { %17 = vsyncpa [#allocation9], 0 }
   0x3   :  { %18 = vsyncpa [#allocation4], 0 }
   0x4   :  { %19 = vsyncpa [#allocation12], 0  ;;  %s2177_s30 = smov [#allocation5]   ;;  %s2013_s13 = scalar_lea.hbm %s2429_s1, 256 }
   0x5   :  { %s35_s10 = sshll.u32 %s2177_s30, 4  ;;  %p2014_p0 = scmp.ne.s32.totalorder %s2429_s1, %s2013_s13  ;;  %s36_s10 = int_to_ptr.vmem [resolvable:$true] %s35_s10 }
   0x6   :  { %p2017_p1 = scmp.lt.u32.totalorder %s2013_s13, %s2429_s1 }
   0x8   :  { %p2019_p2 = pnand %p2017_p1, %p2014_p0 }
   0xa   :  { %2022 = shalt.err (!%p2019_p2)
}
   0xb   :  { %s2023_s18 = scalar_lea.vmem %s36_s10, 256  ;;  %p2028_p4 = scmp.lt.s32.totalorder %s36_s10, %s36_s10 }
   0xc   :  { %p2024_p3 = scmp.ne.s32.totalorder %s36_s10, %s2023_s18  ;;  %p2029_p5 = scmp.lt.s32.totalorder %s2023_s18, %s2023_s18 }
   0xe   :  { %p2030_p6 = por %p2029_p5, %p2028_p4 }
  0x10   :  { %p2031_p7 = pnand %p2030_p6, %p2024_p3 }
  0x12   :  { %2034 = shalt.err (!%p2031_p7)
}
  0x13   :  { %s2178_s19 = smov 128   ;;  %s2179_s20 = smov 8  }
  0x14   :  { %41 = dma.hbm_to_vmem [thread:$0]  %s2429_s1, 256, %s36_s10, [#allocation6], %s2178_s19, %s2178_s19, %s2179_s20  }
  0x15   :  { %s2180_s23 = smov [#allocation2]   ;;  %s2181_s25 = smov [#allocation7]  }
  0x16   :  { %s26_s24 = sshll.u32 %s2180_s23, 4  ;;  %s49_s26 = sshll.u32 %s2181_s25, 4  ;;  %s27_s24 = int_to_ptr.vmem [resolvable:$true] %s26_s24  ;;  %s50_s26 = int_to_ptr.vmem [resolvable:$true] %s49_s26 }
  0x17   :  { %s2035_s29 = scalar_lea.hbm %s2428_s0, 128 }
  0x18   :  { %p2036_p8 = scmp.ne.s32.totalorder %s2428_s0, %s2035_s29  ;;  %p2039_p9 = scmp.lt.u32.totalorder %s2035_s29, %s2428_s0 }
  0x1a   :  { %p2041_p10 = pnand %p2039_p9, %p2036_p8 }
  0x1c   :  { %2044 = shalt.err (!%p2041_p10)
}
  0x1d   :  { %s2045_s1 = scalar_lea.vmem %s27_s24, 128  ;;  %p2050_p12 = scmp.lt.s32.totalorder %s27_s24, %s27_s24 }
  0x1e   :  { %p2046_p11 = scmp.ne.s32.totalorder %s27_s24, %s2045_s1  ;;  %p2051_p13 = scmp.lt.s32.totalorder %s2045_s1, %s2045_s1 }
  0x20   :  { %p2052_p0 = por %p2051_p13, %p2050_p12 }
  0x22   :  { %p2053_p1 = pnand %p2052_p0, %p2046_p11 }
  0x24   :  { %2056 = shalt.err (!%p2053_p1)
}
  0x25   :  { %29 = dma.hbm_to_vmem [thread:$0]  %s2428_s0, 128, %s27_s24, [#allocation3]  }
  0x26   :  { %s2057_s17 = scalar_lea.hbm %s2431_s3, 512 }
  0x27   :  { %p2058_p2 = scmp.ne.s32.totalorder %s2431_s3, %s2057_s17  ;;  %p2061_p3 = scmp.lt.u32.totalorder %s2057_s17, %s2431_s3 }
  0x29   :  { %p2063_p4 = pnand %p2061_p3, %p2058_p2 }
  0x2b   :  { %2066 = shalt.err (!%p2063_p4)
}
  0x2c   :  { %s2067_s25 = scalar_lea.vmem %s50_s26, 512  ;;  %p2072_p6 = scmp.lt.s32.totalorder %s50_s26, %s50_s26 }
  0x2d   :  { %p2068_p5 = scmp.ne.s32.totalorder %s50_s26, %s2067_s25  ;;  %p2073_p7 = scmp.lt.s32.totalorder %s2067_s25, %s2067_s25 }
  0x2f   :  { %p2074_p8 = por %p2073_p7, %p2072_p6 }
  0x31   :  { %p2075_p9 = pnand %p2074_p8, %p2068_p5 }
  0x33   :  { %2078 = shalt.err (!%p2075_p9)
}
  0x34   :  { %55 = dma.hbm_to_vmem [thread:$0]  %s2431_s3, 512, %s50_s26, [#allocation6], %s2178_s19, %s2178_s19, %s2179_s20  }
  0x35   :  { %s2182_s27 = smov [#allocation8]   ;;  %s2079_s11 = scalar_lea.hbm %s2433_s5, 1024 }
  0x36   :  { %s63_s28 = sshll.u32 %s2182_s27, 4  ;;  %p2080_p10 = scmp.ne.s32.totalorder %s2433_s5, %s2079_s11  ;;  %s64_s28 = int_to_ptr.vmem [resolvable:$true] %s63_s28 }
  0x37   :  { %p2083_p11 = scmp.lt.u32.totalorder %s2079_s11, %s2433_s5 }
  0x39   :  { %p2085_p12 = pnand %p2083_p11, %p2080_p10 }
  0x3b   :  { %2088 = shalt.err (!%p2085_p12)
}
  0x3c   :  { %s2089_s14 = scalar_lea.vmem %s64_s28, 1024  ;;  %p2094_p0 = scmp.lt.s32.totalorder %s64_s28, %s64_s28 }
  0x3d   :  { %p2090_p13 = scmp.ne.s32.totalorder %s64_s28, %s2089_s14  ;;  %p2095_p1 = scmp.lt.s32.totalorder %s2089_s14, %s2089_s14 }
  0x3f   :  { %p2096_p2 = por %p2095_p1, %p2094_p0 }
  0x41   :  { %p2097_p3 = pnand %p2096_p2, %p2090_p13 }
  0x43   :  { %2100 = shalt.err (!%p2097_p3)
}
  0x44   :  { %s2183_s3 = smov 256   ;;  %s2184_s26 = smov 16  }
  0x45   :  { %69 = dma.hbm_to_vmem [thread:$0]  %s2433_s5, 1024, %s64_s28, [#allocation9], %s2183_s3, %s2183_s3, %s2184_s26  }
  0x46   :  { %2167 = dma.done.wait [#allocation3], 128  }
  0x47   :  { %2168 = vsyncadd [#allocation3], 4294967168 }
  0x48   :  { %2169 = dma.done.wait [#allocation6], 768  }
  0x49   :  { %2170 = vsyncadd [#allocation6], 4294966528 }
  0x4a   :  { %2171 = dma.done.wait [#allocation9], 1024  }
  0x4b   :  { %2172 = vsyncadd [#allocation9], 4294966272  ;;  %v2185_v0 = vmov 0.0|0.0   ;;  %vm2186_vm0 = vmmov 0   ;;  %v2187_v1 = vmov 0.0   ;;  %vm94_vm1 = vcmask 130048  }
  0x4c   :  { %1866 = vmatprep.subr.bf16.mxu0 %v2185_v0  ;;  %1766 = vmatprep.mubr.msk.f32.mxu0 %vm2186_vm0, %v2187_v1  ;;  %v85_v2 = vld [vmem:[#allocation5] sm:$0xff]  ;;  %v86_v3 = vld [vmem:[#allocation5 + $0x8] sm:$0xff]  ;;  %v84_v4 = vld [vmem:[#allocation2] sm:$0xff]  ;;  %vm569_vm2 = vcmask 261120  }
  0x4d   :  { %1863 = vmatprep.subr.bf16.mxu1 %v2185_v0  ;;  %1759 = vmatprep.mubr.msk.f32.mxu1 %vm2186_vm0, %v2187_v1  ;;  %v99_v5 = vand.u32 4294901760, %v85_v2  ;;  %v102_v6 = vand.u32 4294901760, %v86_v3  ;;  %v96_v7 = vsel %vm94_vm1, %v84_v4, 0  ;;  %v558_v25 = vld [vmem:[#allocation7] sm:$0xff]  ;;  %v559_v26 = vld [vmem:[#allocation7 + $0x8] sm:$0xff]  ;;  %v560_v32 = vld [vmem:[#allocation7 + $0x10] sm:$0xff] }
  0x4e   :  { %v165_v8 = vand.u32 4294901760, %v96_v7  ;;  %v574_v27 = vand.u32 4294901760, %v558_v25  ;;  %v577_v28 = vand.u32 4294901760, %v559_v26  ;;  %v561_v33 = vld [vmem:[#allocation7 + $0x18] sm:$0xff]  ;;  %v580_v34 = vand.u32 4294901760, %v560_v32 }
  0x4f   :  { %v177_v9 = vsub.f32 %v85_v2, %v99_v5  ;;  %v184_v10 = vsub.f32 %v86_v3, %v102_v6  ;;  %v1864_v11 = vpack.c.bf16 %v102_v6, %v99_v5  ;;  %v583_v35 = vand.u32 4294901760, %v561_v33  ;;  %v1704_v59 = vld [vmem:[%s2430_s2] ss:$0 sm:$0xff] }
  0x50   :  { %v166_v12 = vsub.f32 %v96_v7, %v165_v8  ;;  %v2320_v29 = vpack.c.bf16 %v577_v28, %v574_v27  ;;  %v654_v30 = vsub.f32 %v558_v25, %v574_v27  ;;  %v661_v31 = vsub.f32 %v559_v26, %v577_v28  ;;  %v1064_v26 = vld [vmem:[#allocation8 + $0x20] sm:$0xff]  ;;  %v1066_v27 = vld [vmem:[#allocation8 + $0x30] sm:$0xff] }
  0x51   :  { %v178_v13 = vand.u32 4294901760, %v177_v9  ;;  %v185_v14 = vand.u32 4294901760, %v184_v10  ;;  %1865 = vmatpush3.bf16.msra.mxu1 %v1864_v11  ;;  %v1870_v23 = vpack.c.bf16 %v184_v10, %v177_v9  ;;  %v2324_v38 = vpack.c.bf16 %v583_v35, %v580_v34 }
  0x52   :  { %v167_v15 = vand.u32 4294901760, %v166_v12  ;;  %1881 = vmatprep.subr.bf16.mxu1 %v2185_v0  ;;  %v655_v36 = vand.u32 4294901760, %v654_v30  ;;  %v662_v37 = vand.u32 4294901760, %v661_v31  ;;  %v668_v39 = vsub.f32 %v560_v32, %v580_v34 }
  0x53   :  { %v179_v16 = vsub.f32 %v177_v9, %v178_v13  ;;  %v186_v17 = vsub.f32 %v184_v10, %v185_v14  ;;  %v1876_v24 = vpack.c.bf16 %v185_v14, %v178_v13  ;;  %v675_v40 = vsub.f32 %v561_v33, %v583_v35  ;;  %v1061_v9 = vld [vmem:[#allocation8 + $0x8] sm:$0xff]  ;;  %v1063_v10 = vld [vmem:[#allocation8 + $0x18] sm:$0xff]  ;;  %v1060_v13 = vld [vmem:[#allocation8] sm:$0xff] }
  0x54   :  { %v168_v18 = vsub.f32 %v166_v12, %v167_v15  ;;  %v656_v41 = vsub.f32 %v654_v30, %v655_v36  ;;  %v663_v42 = vsub.f32 %v661_v31, %v662_v37  ;;  %v669_v44 = vand.u32 4294901760, %v668_v39  ;;  %v1062_v14 = vld [vmem:[#allocation8 + $0x10] sm:$0xff] }
  0x55   :  { %v180_v19 = vand.u32 4294901760, %v179_v16  ;;  %v187_v20 = vand.u32 4294901760, %v186_v17  ;;  %v676_v45 = vand.u32 4294901760, %v675_v40  ;;  %v1894_v53 = vpack.c.bf16 %v661_v31, %v654_v30 }
  0x56   :  { %v169_v21 = vand.u32 4294901760, %v168_v18  ;;  %v657_v43 = vand.u32 4294901760, %v656_v41  ;;  %v664_v46 = vand.u32 4294901760, %v663_v42  ;;  %v670_v47 = vsub.f32 %v668_v39, %v669_v44 }
  0x57   :  { %v1867_v22 = vpack.c.bf16 %v187_v20, %v180_v19  ;;  %v677_v48 = vsub.f32 %v675_v40, %v676_v45  ;;  %v1897_v54 = vpack.c.bf16 %v675_v40, %v668_v39  ;;  %v1906_v55 = vpack.c.bf16 %v662_v37, %v655_v36 }
  0x58   :  { %1760 = vmatmul.mubr.f32.vlgmr.msra.gmra.mrb[0].mxu1 %v169_v21  ;;  %v1888_v49 = vpack.c.bf16 %v664_v46, %v657_v43  ;;  %v671_v50 = vand.u32 4294901760, %v670_v47  ;;  %v1909_v56 = vpack.c.bf16 %v676_v45, %v669_v44  ;;  %v1077_v16 = vand.u32 4294901760, %v1062_v14  ;;  %v1067_v21 = vld [vmem:[#allocation8 + $0x38] sm:$0xff] }
  0x59   :  { %1868 = vmatpush3.bf16.msra.mxu0 %v1867_v22  ;;  %1805 = vmatprep.mubr.msk.f32.mxu1 %vm2186_vm0, %v2187_v1  ;;  %v678_v51 = vand.u32 4294901760, %v677_v48  ;;  %v1083_v25 = vand.u32 4294901760, %v1067_v21  ;;  %v1081_v30 = vand.u32 4294901760, %v1064_v26  ;;  %v1085_v31 = vand.u32 4294901760, %v1066_v27 }
  0x5a   :  { %1869 = vmatprep.subr.bf16.mxu0 %v2185_v0  ;;  %1883 = vmatpush3.bf16.msra.mxu1 %v2320_v29  ;;  %v2358_v20 = vsub.f32 %v1062_v14, %v1077_v16 }
  0x5b   :  { %1884 = vmatprep.subr.bf16.mxu1 %v2185_v0  ;;  %v1891_v52 = vpack.c.bf16 %v678_v51, %v671_v50  ;;  %v1192_v35 = vsub.f32 %v1067_v21, %v1083_v25  ;;  %v1198_v39 = vsub.f32 %v1066_v27, %v1085_v31 }
  0x5c   :  { %1767 = vmatmul.mubr.f32.vlgmr.msra.gmra.mrb[0].mxu0 %v165_v8 }
  0x5d   :  { %1871 = vmatpush3.bf16.msra.mxu0 %v1870_v23  ;;  %1773 = vmatprep.mubr.msk.f32.mxu0 %vm2186_vm0, %v2187_v1  ;;  %v1193_v43 = vand.u32 4294901760, %v1192_v35  ;;  %v1199_v47 = vand.u32 4294901760, %v1198_v39 }
  0x5e   :  { %1872 = vmatprep.subr.bf16.mxu0 %v2185_v0  ;;  %1886 = vmatpush3.bf16.msra.mxu1 %v2324_v38 }
  0x5f   :  { %1887 = vmatprep.subr.bf16.mxu1 %v2185_v0  ;;  %v1194_v50 = vsub.f32 %v1192_v35, %v1193_v43 }
  0x64   :  { %1774 = vmatmul.mubr.f32.vlgmr.msra.gmra.mrb[0].mxu0 %v166_v12  ;;  %v1075_v12 = vand.u32 4294901760, %v1063_v10 }
  0x65   :  { %1874 = vmatpush3.bf16.msra.mxu0 %v1864_v11  ;;  %1780 = vmatprep.mubr.msk.f32.mxu0 %vm2186_vm0, %v2187_v1 }
  0x66   :  { %1875 = vmatprep.subr.bf16.mxu0 %v2185_v0  ;;  %v1168_v18 = vsub.f32 %v1063_v10, %v1075_v12  ;;  %v1705_v10 = vld [vmem:[%s2432_s4] ss:$0 sm:$0xff]  ;;  %s2188_s4 = smov [#allocation10]  }
  0x67   :  { %s1662_s21 = sshll.u32 %s2188_s4, 4  ;;  %s1663_s21 = int_to_ptr.vmem [resolvable:$true] %s1662_s21 }
  0x68   :  { %v1169_v23 = vand.u32 4294901760, %v1168_v18  ;;  %s2101_s25 = scalar_lea.vmem %s1663_s21, 128  ;;  %p2106_p5 = scmp.lt.s32.totalorder %s1663_s21, %s1663_s21 }
  0x69   :  { %p2102_p4 = scmp.ne.s32.totalorder %s1663_s21, %s2101_s25  ;;  %p2107_p6 = scmp.lt.s32.totalorder %s2101_s25, %s2101_s25 }
  0x6a   :  { %v1170_v33 = vsub.f32 %v1168_v18, %v1169_v23 }
  0x6b   :  { %p2108_p7 = por %p2107_p6, %p2106_p5 }
  0x6c   :  { %1781 = vmatmul.mubr.f32.vlgmr.msra.gmra.mrb[0].mxu0 %v167_v15  ;;  %v1073_v15 = vand.u32 4294901760, %v1060_v13  ;;  %v1171_v41 = vand.u32 4294901760, %v1170_v33 }
  0x6d   :  { %1877 = vmatpush3.bf16.msra.mxu0 %v1876_v24  ;;  %1787 = vmatprep.mubr.msk.f32.mxu0 %vm2186_vm0, %v2187_v1  ;;  %p2109_p8 = pnand %p2108_p7, %p2102_p4 }
  0x6e   :  { %1878 = vmatprep.subr.bf16.mxu0 %v2185_v0  ;;  %v2356_v19 = vsub.f32 %v1060_v13, %v1073_v15 }
  0x70   :  { %v1163_v28 = vand.u32 4294901760, %v2356_v19 }
  0x72   :  { %v1164_v36 = vsub.f32 %v2356_v19, %v1163_v28 }
  0x74   :  { %1788 = vmatmul.mubr.f32.vlgmr.msra.gmra.mrb[0].mxu0 %v165_v8  ;;  %v1165_v44 = vand.u32 4294901760, %v1164_v36 }
  0x75   :  { %1880 = vmatpush3.bf16.msra.mxu0 %v1864_v11  ;;  %1794 = vmatprep.mubr.msk.f32.mxu0 %vm2186_vm0, %v2187_v1  ;;  %v1071_v11 = vand.u32 4294901760, %v1061_v9 }
  0x77   :  { %v1156_v17 = vsub.f32 %v1061_v9, %v1071_v11 }
  0x79   :  { %v1157_v22 = vand.u32 4294901760, %v1156_v17 }
  0x7b   :  { %v1158_v32 = vsub.f32 %v1156_v17, %v1157_v22 }
  0x7c   :  { %1795 = vmatmul.mubr.f32.vlgmr.msra.gmra.mrb[0].mxu0 %v165_v8 }
  0x7d   :  { %1259 = vmatprep.mubr.f32.mxu0 %v2187_v1  ;;  %v1159_v40 = vand.u32 4294901760, %v1158_v32 }
  0x7f   :  { %v1925_v48 = vpack.c.bf16 %v1171_v41, %v1159_v40 }
  0x81   :  { %1926 = vmatprep.subr.bf16.mxu0 %v1925_v48 }
 0x12b   :  { %v171_v57 = vpop.f32.mrb[0].mxu1 }
 0x12c   :  { %v1761_v58 = vpop.f32.mrb[1].mxu1  ;;  %v172_v60 = vadd.f32 %v1704_v59, %v171_v57 }
 0x14f   :  { %v553_v61 = vpop.f32.mrb[0].mxu0 }
 0x150   :  { %v1966_v62 = vadd.f32 %v553_v61, %v172_v60  ;;  %v1796_v63 = vpop.f32.mrb[1].mxu0  ;;  %v1917_v60 = vpack.c.bf16 %v1075_v12, %v1071_v11  ;;  %v1933_v61 = vpack.c.bf16 %v1168_v18, %v1156_v17 }
 0x151   :  { %v1935_v63 = vpack.c.bf16 %v2358_v20, %v2356_v19 }
 0x152   :  { %v557_v2 = vmax.f32 %v1966_v62, 0.0  ;;  %v1919_v62 = vpack.c.bf16 %v1077_v16, %v1073_v15 }
 0x154   :  { %v571_v3 = vsel %vm569_vm2, %v557_v2, 0 }
 0x155   :  { %v642_v4 = vand.u32 4294901760, %v571_v3 }
 0x157   :  { %v643_v5 = vsub.f32 %v571_v3, %v642_v4 }
 0x159   :  { %v644_v6 = vand.u32 4294901760, %v643_v5 }
 0x15b   :  { %v645_v7 = vsub.f32 %v643_v5, %v644_v6 }
 0x15d   :  { %v646_v8 = vand.u32 4294901760, %v645_v7 }
 0x15f   :  { %1806 = vmatmul.mubr.f32.vlgmr.msra.gmra.mrb[2].mxu1 %v646_v8 }
 0x160   :  { %1889 = vmatpush3.bf16.msra.mxu1 %v1888_v49  ;;  %1816 = vmatprep.mubr.msk.f32.mxu1 %vm2186_vm0, %v2187_v1 }
 0x161   :  { %1890 = vmatprep.subr.bf16.mxu1 %v2185_v0 }
 0x164   :  { %1892 = vmatpush3.bf16.msra.mxu1 %v1891_v52 }
 0x165   :  { %1893 = vmatprep.subr.bf16.mxu1 %v2185_v0 }
 0x167   :  { %1817 = vmatmul.mubr.f32.vlgmr.msra.gmra.mrb[2].mxu1 %v642_v4 }
 0x168   :  { %1895 = vmatpush3.bf16.msra.mxu1 %v1894_v53  ;;  %1827 = vmatprep.mubr.msk.f32.mxu1 %vm2186_vm0, %v2187_v1  ;;  %v1200_v53 = vsub.f32 %v1198_v39, %v1199_v47 }
 0x169   :  { %1896 = vmatprep.subr.bf16.mxu1 %v2185_v0 }
 0x16a   :  { %v1201_v57 = vand.u32 4294901760, %v1200_v53 }
 0x16c   :  { %1898 = vmatpush3.bf16.msra.mxu1 %v1897_v54 }
 0x16d   :  { %1899 = vmatprep.subr.bf16.mxu1 %v2185_v0 }
 0x16f   :  { %1828 = vmatmul.mubr.f32.vlgmr.msra.gmra.mrb[2].mxu1 %v643_v5 }
 0x170   :  { %1901 = vmatpush3.bf16.msra.mxu1 %v2320_v29  ;;  %1838 = vmatprep.mubr.msk.f32.mxu1 %vm2186_vm0, %v2187_v1 }
 0x171   :  { %1902 = vmatprep.subr.bf16.mxu1 %v2185_v0 }
 0x174   :  { %1904 = vmatpush3.bf16.msra.mxu1 %v2324_v38 }
 0x175   :  { %1905 = vmatprep.subr.bf16.mxu1 %v2185_v0 }
 0x177   :  { %1839 = vmatmul.mubr.f32.vlgmr.msra.gmra.mrb[2].mxu1 %v644_v6  ;;  %v1949_v6 = vpack.c.bf16 %v1169_v23, %v1157_v22  ;;  %v1706_v23 = vld [vmem:[%s2434_s6] ss:$0 sm:$0xff] }
 0x178   :  { %1907 = vmatpush3.bf16.msra.mxu1 %v1906_v55  ;;  %1849 = vmatprep.mubr.msk.f32.mxu1 %vm2186_vm0, %v2187_v1  ;;  %v1195_v55 = vand.u32 4294901760, %v1194_v50 }
 0x179   :  { %1908 = vmatprep.subr.bf16.mxu1 %v2185_v0 }
 0x17c   :  { %1910 = vmatpush3.bf16.msra.mxu1 %v1909_v56 }
 0x17d   :  { %1911 = vmatprep.subr.bf16.mxu1 %v2185_v0 }
 0x17f   :  { %1850 = vmatmul.mubr.f32.vlgmr.msra.gmra.mrb[2].mxu1 %v642_v4 }
 0x180   :  { %1913 = vmatpush3.bf16.msra.mxu1 %v2320_v29  ;;  %1860 = vmatprep.mubr.msk.f32.mxu1 %vm2186_vm0, %v2187_v1  ;;  %v1175_v29 = vand.u32 4294901760, %v2358_v20 }
 0x181   :  { %1914 = vmatprep.subr.bf16.mxu1 %v2185_v0  ;;  %v1065_v0 = vld [vmem:[#allocation8 + $0x28] sm:$0xff] }
 0x182   :  { %v1079_v24 = vand.u32 4294901760, %v1065_v0  ;;  %v1176_v37 = vsub.f32 %v2358_v20, %v1175_v29  ;;  %v1951_v7 = vpack.c.bf16 %v1175_v29, %v1163_v28 }
 0x184   :  { %1916 = vmatpush3.bf16.msra.mxu1 %v2324_v38  ;;  %v1180_v34 = vsub.f32 %v1065_v0, %v1079_v24  ;;  %v1186_v38 = vsub.f32 %v1064_v26, %v1081_v30  ;;  %v1177_v45 = vand.u32 4294901760, %v1176_v37  ;;  %v1921_v2 = vpack.c.bf16 %v1083_v25, %v1079_v24 }
 0x185   :  { %1918 = vmatprep.subr.bf16.mxu1 %v1917_v60 }
 0x186   :  { %v1181_v42 = vand.u32 4294901760, %v1180_v34  ;;  %v1187_v46 = vand.u32 4294901760, %v1186_v38  ;;  %v1927_v51 = vpack.c.bf16 %v1177_v45, %v1165_v44  ;;  %v1937_v3 = vpack.c.bf16 %v1192_v35, %v1180_v34 }
 0x187   :  { %1861 = vmatmul.mubr.f32.vlgmr.msra.gmra.mrb[2].mxu1 %v642_v4  ;;  %v1923_v4 = vpack.c.bf16 %v1085_v31, %v1081_v30  ;;  %v1939_v5 = vpack.c.bf16 %v1198_v39, %v1186_v38 }
 0x188   :  { %1143 = vmatprep.mubr.f32.mxu1 %v2187_v1  ;;  %v1182_v49 = vsub.f32 %v1180_v34, %v1181_v42  ;;  %v1188_v52 = vsub.f32 %v1186_v38, %v1187_v46  ;;  %1928 = vmatpush1.bf16.msra.mxu0 %v1927_v51  ;;  %v1953_v8 = vpack.c.bf16 %v1193_v43, %v1181_v42 }
 0x189   :  { %1920 = vmatpush1.bf16.msra.mxu1 %v1919_v62  ;;  %v1955_v9 = vpack.c.bf16 %v1199_v47, %v1187_v46 }
 0x18a   :  { %v1183_v54 = vand.u32 4294901760, %v1182_v49  ;;  %v1189_v56 = vand.u32 4294901760, %v1188_v52  ;;  %1922 = vmatprep.subr.bf16.mxu1 %v1921_v2 }
 0x18c   :  { %v1929_v58 = vpack.c.bf16 %v1195_v55, %v1183_v54  ;;  %v1931_v59 = vpack.c.bf16 %v1201_v57, %v1189_v56 }
 0x18d   :  { %1924 = vmatpush1.bf16.msra.mxu1 %v1923_v4 }
 0x18e   :  { %1930 = vmatprep.subr.bf16.mxu0 %v1929_v58 }
 0x18f   :  { %1932 = vmatpush1.bf16.msra.mxu0 %v1931_v59 }
 0x190   :  { %1934 = vmatprep.subr.bf16.mxu0 %v1933_v61 }
 0x25a   :  { %v1054_v11 = vpop.f32.mrb[2].mxu1 }
 0x25b   :  { %v1967_v12 = vadd.f32 %v1705_v10, %v1054_v11  ;;  %v1862_v13 = vpop.f32.mrb[3].mxu1 }
 0x25d   :  { %v1058_v14 = vmax.f32 %v1967_v12, 0.0 }
 0x25f   :  { %v1069_v15 = vsel %vm569_vm2, %v1058_v14, 0  ;;  %1059 = vst.msk [vmem:[#allocation10] sm:$0xff] %vm569_vm2, %v1058_v14 }
 0x260   :  { %v1144_v16 = vand.u32 4294901760, %v1069_v15 }
 0x262   :  { %v1145_v17 = vsub.f32 %v1069_v15, %v1144_v16  ;;  %1261 = vmatmul.mubr.f32.vlgmr.msra.gmra.mrb[2].mxu0 %v1144_v16 }
 0x263   :  { %1936 = vmatpush1.bf16.msra.mxu0 %v1935_v63  ;;  %1347 = vmatprep.mubr.f32.mxu0 %v2187_v1 }
 0x264   :  { %v1146_v18 = vand.u32 4294901760, %v1145_v17  ;;  %1938 = vmatprep.subr.bf16.mxu0 %v1937_v3 }
 0x266   :  { %v1147_v19 = vsub.f32 %v1145_v17, %v1146_v18 }
 0x267   :  { %1940 = vmatpush1.bf16.msra.mxu0 %v1939_v5 }
 0x268   :  { %v1148_v20 = vand.u32 4294901760, %v1147_v19  ;;  %1942 = vmatprep.subr.bf16.mxu0 %v1917_v60 }
 0x26a   :  { %1149 = vmatmul.mubr.f32.vlgmr.msra.gmra.mrb[4].mxu1 %v1148_v20  ;;  %1350 = vmatmul.mubr.f32.vlgmr.msra.gmra.mrb[2].mxu0 %v1145_v17 }
 0x26b   :  { %1944 = vmatpush1.bf16.msra.mxu0 %v1919_v62  ;;  %1428 = vmatprep.mubr.f32.mxu0 %v2187_v1 }
 0x26c   :  { %1946 = vmatprep.subr.bf16.mxu0 %v1921_v2 }
 0x26f   :  { %1948 = vmatpush1.bf16.msra.mxu0 %v1923_v4 }
 0x270   :  { %1950 = vmatprep.subr.bf16.mxu0 %v1949_v6 }
 0x272   :  { %1432 = vmatmul.mubr.f32.vlgmr.msra.gmra.mrb[2].mxu0 %v1146_v18 }
 0x273   :  { %1952 = vmatpush1.bf16.msra.mxu0 %v1951_v7  ;;  %1526 = vmatprep.mubr.f32.mxu0 %v2187_v1 }
 0x274   :  { %1954 = vmatprep.subr.bf16.mxu0 %v1953_v8 }
 0x277   :  { %1956 = vmatpush1.bf16.msra.mxu0 %v1955_v9 }
 0x278   :  { %1958 = vmatprep.subr.bf16.mxu0 %v1917_v60 }
 0x27a   :  { %1528 = vmatmul.mubr.f32.vlgmr.msra.gmra.mrb[2].mxu0 %v1144_v16 }
 0x27b   :  { %1960 = vmatpush1.bf16.msra.mxu0 %v1919_v62  ;;  %1606 = vmatprep.mubr.f32.mxu0 %v2187_v1 }
 0x27c   :  { %1962 = vmatprep.subr.bf16.mxu0 %v1921_v2 }
 0x27f   :  { %1964 = vmatpush1.bf16.msra.mxu0 %v1923_v4 }
 0x282   :  { %1608 = vmatmul.mubr.f32.vlgmr.msra.gmra.mrb[2].mxu0 %v1144_v16 }
 0x33d   :  { %v1150_v0 = vpop.f32.mrb[4].mxu1 }
 0x33e   :  { %v1152_v21 = vpop.f32.mrb[5].mxu1 }
 0x355   :  { %v1609_v22 = vpop.f32.mrb[2].mxu0 }
 0x356   :  { %v1968_v24 = vadd.f32 %v1609_v22, %v1150_v0  ;;  %v1611_v25 = vpop.f32.mrb[3].mxu0 }
 0x357   :  { %2112 = shalt.err (!%p2109_p8)
}
 0x358   :  { %s2113_s27 = scalar_lea.hbm %s2435_s7, 128 }
 0x359   :  { %p2114_p9 = scmp.ne.s32.totalorder %s2435_s7, %s2113_s27  ;;  %p2117_p10 = scmp.lt.u32.totalorder %s2113_s27, %s2435_s7 }
 0x35b   :  { %p2119_p11 = pnand %p2117_p10, %p2114_p9 }
 0x35d   :  { %2122 = shalt.err (!%p2119_p11)
}
 0x35e   :  { %1665 = dma.vmem_to_hbm [thread:$0]  %s1663_s21, 128, %s2435_s7, [#allocation4]   ;;  %v1969_v1 = vadd.f32 %v1611_v25, %v1152_v21  ;;  %v1621_v26 = vadd.f32 %v1968_v24, %v1706_v23 }
 0x35f   :  { %s2189_s13 = smov 96   ;;  %s2190_s1 = smov 32  }
 0x360   :  { %1623 = vst.msk [vmem:[#allocation13] sm:$0xff] %vm569_vm2, %v1969_v1  ;;  %1631 = vrot.lane.b32.xlu1 %v1969_v1, %s2189_s13  ;;  %1622 = vst.msk [vmem:[#allocation11] sm:$0xff] %vm569_vm2, %v1621_v26  ;;  %1625 = vrot.lane.b32.xlu0 %v1621_v26, %s2189_s13  ;;  %s2191_s10 = smov 64   ;;  %s2192_s7 = smov [#allocation11]  }
 0x361   :  { %s1671_s14 = sshll.u32 %s2192_s7, 4  ;;  %s2193_s3 = smov [#allocation13]   ;;  %s1672_s14 = int_to_ptr.vmem [resolvable:$true] %s1671_s14 }
 0x362   :  { %s1683_s26 = sshll.u32 %s2193_s3, 4  ;;  %s2123_s15 = scalar_lea.vmem %s1672_s14, 512  ;;  %s1684_s26 = int_to_ptr.vmem [resolvable:$true] %s1683_s26 }
 0x363   :  { %p2124_p12 = scmp.ne.s32.totalorder %s1672_s14, %s2123_s15  ;;  %p2128_p13 = scmp.lt.s32.totalorder %s1672_s14, %s1672_s14 }
 0x364   :  { %1646 = vrot.lane.b32.xlu1 %v1621_v26, %s2190_s1  ;;  %1636 = vrot.lane.b32.xlu0 %v1621_v26, %s2191_s10  ;;  %p2129_p0 = scmp.lt.s32.totalorder %s2123_s15, %s2123_s15 }
 0x366   :  { %p2130_p1 = por %p2129_p0, %p2128_p13 }
 0x368   :  { %1651 = vrot.lane.b32.xlu1 %v1969_v1, %s2190_s1  ;;  %1641 = vrot.lane.b32.xlu0 %v1969_v1, %s2191_s10  ;;  %p2131_p2 = pnand %p2130_p1, %p2124_p12 }
 0x3d2   :  { %v1632_v27 = vpop.permute.xlu1 %1631  ;;  %v1626_v28 = vpop.permute.xlu0 %1625 }
 0x3d3   :  { %1635 = vst.msk [vmem:[#allocation13 + $0x8] sm:$0xff] %vm569_vm2, %v1632_v27  ;;  %1629 = vst.msk [vmem:[#allocation11 + $0x8] sm:$0xff] %vm569_vm2, %v1626_v28 }
 0x3d6   :  { %v1647_v29 = vpop.permute.xlu1 %1646  ;;  %v1637_v30 = vpop.permute.xlu0 %1636 }
 0x3d7   :  { %1650 = vst.msk [vmem:[#allocation11 + $0x18] sm:$0xff] %vm569_vm2, %v1647_v29  ;;  %1640 = vst.msk [vmem:[#allocation11 + $0x10] sm:$0xff] %vm569_vm2, %v1637_v30 }
 0x3d8   :  { %2134 = shalt.err (!%p2131_p2)
}
 0x3d9   :  { %s2135_s17 = scalar_lea.hbm %s2436_s8, 512 }
 0x3da   :  { %p2136_p3 = scmp.ne.s32.totalorder %s2436_s8, %s2135_s17  ;;  %p2139_p4 = scmp.lt.u32.totalorder %s2135_s17, %s2436_s8 }
 0x3dc   :  { %p2141_p5 = pnand %p2139_p4, %p2136_p3 }
 0x3de   :  { %2144 = shalt.err (!%p2141_p5)
}
 0x3df   :  { %1677 = dma.vmem_to_hbm [thread:$0]  %s1672_s14, 512, %s2436_s8, [#allocation12], %s2178_s19, %s2178_s19, %s2179_s20   ;;  %v1652_v31 = vpop.permute.xlu1 %1651  ;;  %v1642_v32 = vpop.permute.xlu0 %1641 }
 0x3e0   :  { %1655 = vst.msk [vmem:[#allocation13 + $0x18] sm:$0xff] %vm569_vm2, %v1652_v31  ;;  %1645 = vst.msk [vmem:[#allocation13 + $0x10] sm:$0xff] %vm569_vm2, %v1642_v32  ;;  %s2145_s25 = scalar_lea.vmem %s1684_s26, 512  ;;  %p2150_p7 = scmp.lt.s32.totalorder %s1684_s26, %s1684_s26 }
 0x3e1   :  { %p2146_p6 = scmp.ne.s32.totalorder %s1684_s26, %s2145_s25  ;;  %p2151_p8 = scmp.lt.s32.totalorder %s2145_s25, %s2145_s25 }
 0x3e3   :  { %p2152_p9 = por %p2151_p8, %p2150_p7 }
 0x3e5   :  { %p2153_p10 = pnand %p2152_p9, %p2146_p6 }
 0x3e7   :  { %2156 = shalt.err (!%p2153_p10)
}
 0x3e8   :  { %s2157_s27 = scalar_lea.hbm %s2437_s9, 512 }
 0x3e9   :  { %p2158_p11 = scmp.ne.s32.totalorder %s2437_s9, %s2157_s27  ;;  %p2161_p12 = scmp.lt.u32.totalorder %s2157_s27, %s2437_s9 }
 0x3eb   :  { %p2163_p13 = pnand %p2161_p12, %p2158_p11 }
 0x3ed   :  { %2166 = shalt.err (!%p2163_p13)
}
 0x3ee   :  { %1689 = dma.vmem_to_hbm [thread:$0]  %s1684_s26, 512, %s2437_s9, [#allocation12], %s2178_s19, %s2178_s19, %s2179_s20  }
 0x3ef   :  { %2173 = dma.done.wait [#allocation4], 128  }
 0x3f0   :  { %2174 = vsyncadd [#allocation4], 4294967168 }
 0x3f1   :  { %2175 = dma.done.wait [#allocation12], 1024  }
 0x3f2   :  { %2176 = vsyncadd [#allocation12], 4294966272 }
 0x3f3   :  { %1699 = vsyncpa [#allocation3], 1 }
 0x3f4   :  { %1700 = vsyncpa [#allocation6], 1 }
 0x3f5   :  { %1701 = vsyncpa [#allocation9], 1 }
 0x3f6   :  { %1702 = vsyncpa [#allocation4], 1 }
 0x3f7   :  { %1703 = vsyncpa [#allocation12], 1 }

</bundles_post_ra>
